<compile_context>
chip_gen: v5e
topology: v5e:2x2
jax: 0.10.0
libtpu: 0.0.40
codegen_flags: <defaults>
</compile_context>

<pallas_src>
import functools

import jax
import jax.numpy as jnp
from jax.experimental import pallas as pl
from jax.experimental.pallas import tpu as pltpu

KH = KW = 3          # conv kernel size
NEG_SLOPE = 0.01     # F.leaky_relu default
IN_EPS = 1e-5        # nn.InstanceNorm2d default eps


def _upscale_pixel_kernel(p_ref, w_ref, o_ref, *, nb, hw):
    # p_ref: (K_PAD, NB*HW) im2col patches for NB samples (bias row folded in)
    # w_ref: (Cout, K_PAD)  conv weights (+ bias column), resident across steps
    # o_ref: (NB, Cout, HW) normalized, pre-pixel-shuffle output (lane-dense)

    # One fused MXU contraction over K for all NB samples at once.
    acc = jnp.dot(w_ref[...], p_ref[...],
                  preferred_element_type=jnp.float32)       # (Cout, NB*HW)
    act = jnp.where(acc >= 0, acc, NEG_SLOPE * acc)          # LeakyReLU(0.01)

    # InstanceNorm2d: per-sample, per-channel stats over HW.  Each sample is a
    # static 128-aligned lane slice; two-pass (centered) variance for accuracy.
    for m in range(nb):
        seg = act[:, m * hw:(m + 1) * hw]                    # (Cout, HW)
        mean = jnp.mean(seg, axis=1, keepdims=True)          # (Cout, 1)
        cen = seg - mean
        var = jnp.mean(cen * cen, axis=1, keepdims=True)     # biased variance
        o_ref[m] = (cen * jax.lax.rsqrt(var + IN_EPS)).astype(o_ref.dtype)


def upscale_pixel_pallas(x_nchw, w_oihw, bias, *, samples_per_step=8):
    """Forward pass of upscale_pixel.

    x_nchw : (N, Cin, H, W)    float32
    w_oihw : (Cout, Cin, 3, 3) float32, Cout = 4 * outchannel
    bias   : (Cout,)           float32
    returns (N, outchannel, 2H, 2W) float32  (NCHW, like PyTorch)
    """
    N, Cin, H, W = x_nchw.shape
    Cout = w_oihw.shape[0]
    assert Cout % 4 == 0
    outC = Cout // 4
    HW = H * W
    K = KH * KW * Cin
    # +1 row for the folded bias; align to 8 sublanes (f32).  If casting the
    # MXU operands to bf16 at non-toy sizes, align to 16 instead.
    K_PAD = ((K + 1 + 7) // 8) * 8

    NB = max(1, min(samples_per_step, N))        # samples per grid step
    N_pad = ((N + NB - 1) // NB) * NB            # pad batch to multiple of NB

    # ---- glue: pad + im2col, laid out (K, N*HW) so the matmul output and all
    # stores are lane-dense and each grid step covers NB samples ----
    # TODO(synk): at non-toy Cin/H*W, build the patch tile in VMEM from a
    # (Cin, H+2, W+2) input block instead of materializing the 9x im2col in HBM
    # (the patches array is 9x the input bytes and becomes the HBM roofline).
    x_pad = jnp.pad(x_nchw, ((0, 0), (0, 0), (1, 1), (1, 1)))   # (N,Cin,H+2,W+2)
    cols = [x_pad[:, :, kh:kh + H, kw:kw + W]                    # (N,Cin,H,W)
            for kh in range(KH) for kw in range(KW)]
    patches = jnp.stack(cols, axis=0)                            # (9,N,Cin,H,W)
    patches = jnp.transpose(patches, (0, 2, 1, 3, 4))            # (9,Cin,N,H,W)
    patches = patches.reshape(K, N * HW)                         # rows: tap*Cin+cin
    if N_pad > N:
        patches = jnp.pad(patches, ((0, 0), (0, (N_pad - N) * HW)))
    # Fold the bias into the K padding: one row of ones in the patches and the
    # bias as the matching weight column; remaining pad rows/cols stay zero.
    patches = jnp.concatenate(
        [patches,
         jnp.ones((1, N_pad * HW), patches.dtype),
         jnp.zeros((K_PAD - K - 1, N_pad * HW), patches.dtype)], axis=0)

    # weights: (Cout,Cin,KH,KW) -> (Cout,KH,KW,Cin) -> (Cout,K), + bias column.
    w_flat = jnp.transpose(w_oihw, (0, 2, 3, 1)).reshape(Cout, K)
    w_flat = jnp.concatenate(
        [w_flat, bias.reshape(Cout, 1),
         jnp.zeros((Cout, K_PAD - K - 1), w_flat.dtype)], axis=1)

    # NOTE: at non-toy shapes on v6e/v7x, cast `patches`/`w_flat` to bfloat16
    # here (MXU operands only, with K_PAD 16-aligned); keep the post-matmul
    # elementwise/IN math in f32 (mandatory on v5e: no bf16 VPU/EUP).  Also
    # re-derive the HW tile for v7x's 64 MiB VMEM and set vmem_limit_bytes.
    # Kept f32 here to stay within the strict reference tolerance.

    grid = (N_pad // NB,)
    cost = pl.CostEstimate(
        flops=2 * Cout * K_PAD * N_pad * HW,
        transcendentals=N_pad * Cout,                 # rsqrt per (n, channel)
        bytes_accessed=4 * (patches.size + w_flat.size + N_pad * Cout * HW))

    out_flat = pl.pallas_call(
        functools.partial(_upscale_pixel_kernel, nb=NB, hw=HW),
        out_shape=jax.ShapeDtypeStruct((N_pad, Cout, HW), jnp.float32),
        grid_spec=pltpu.PrefetchScalarGridSpec(
            num_scalar_prefetch=0,
            grid=grid,
            in_specs=[
                pl.BlockSpec((K_PAD, NB * HW), lambda i: (0, i)),
                pl.BlockSpec((Cout, K_PAD), lambda i: (0, 0)),
            ],
            out_specs=pl.BlockSpec((NB, Cout, HW), lambda i: (i, 0, 0)),
        ),
        compiler_params=pltpu.CompilerParams(
            dimension_semantics=("parallel",)),
        cost_estimate=cost,
    )(patches, w_flat)

    # ---- glue: PixelShuffle(2) from NCHW ----
    # PyTorch: out[n, c, 2h+i, 2w+j] = in[n, c*4 + i*2 + j, h, w]
    # TODO(synk): fold this lane-axis interleave into the kernel epilogue
    # (store (outC, 4*HW) directly) to avoid the extra HBM pass at scale.
    norm = out_flat[:N].reshape(N, Cout, H, W)
    y = norm.reshape(N, outC, 2, 2, H, W)
    y = jnp.transpose(y, (0, 1, 4, 2, 5, 3))          # (N,outC,H,i,W,j)
    return y.reshape(N, outC, 2 * H, 2 * W)


def _reference(x_nchw, w_oihw, bias):
    """Pure-JAX reference matching the PyTorch module."""
    conv = jax.lax.conv_general_dilated(
        x_nchw, w_oihw, window_strides=(1, 1), padding=((1, 1), (1, 1)),
        dimension_numbers=("NCHW", "OIHW", "NCHW"))
    conv = conv + bias[None, :, None, None]
    act = jnp.where(conv >= 0, conv, NEG_SLOPE * conv)
    mean = jnp.mean(act, axis=(2, 3), keepdims=True)
    var = jnp.mean((act - mean) ** 2, axis=(2, 3), keepdims=True)
    norm = (act - mean) * jax.lax.rsqrt(var + IN_EPS)
    N, C4, H, W = norm.shape
    outC = C4 // 4
    y = norm.reshape(N, outC, 2, 2, H, W)
    y = jnp.transpose(y, (0, 1, 4, 2, 5, 3))
    return y.reshape(N, outC, 2 * H, 2 * W)


if __name__ == "__main__":
    # Small shapes consistent with the module: inchannel=4, outchannel=4,
    # batch=2, spatial=16x16.
    inchannel, outchannel = 4, 4
    N, H, W = 2, 16, 16
    Cout = 4 * outchannel

    key = jax.random.PRNGKey(0)
    kx, kw, kb = jax.random.split(key, 3)
    x = jax.random.normal(kx, (N, inchannel, H, W), dtype=jnp.float32)
    w = jax.random.normal(kw, (Cout, inchannel, KH, KW), dtype=jnp.float32) * 0.1
    b = jax.random.normal(kb, (Cout,), dtype=jnp.float32) * 0.1

    out = jax.block_until_ready(upscale_pixel_pallas(x, w, b))
    ref = jax.block_until_ready(_reference(x, w, b))

    assert out.shape == (N, outchannel, 2 * H, 2 * W), out.shape
    assert jnp.allclose(out, ref, atol=1e-4, rtol=1e-4), (
        float(jnp.max(jnp.abs(out - ref))))
    print("KERNEL_OK")
</pallas_src>

<mosaic_0001>
module attributes {stable_mosaic.version = 11 : i64} {
  func.func @_upscale_pixel_kernel(%arg0: i32, %arg1: memref<40x512xf32, #tpu.memory_space<vmem>>, %arg2: memref<16x40xf32, #tpu.memory_space<vmem>>, %arg3: memref<2x16x256xf32, #tpu.memory_space<vmem>>) attributes {dimension_semantics = [#tpu.dimension_semantics<parallel>], iteration_bounds = array<i64: 1>, scalar_prefetch = 0 : i64, scratch_operands = 0 : i64, tpu.core_type = #tpu.core_type<tc>, window_params = [{transform_indices = @transform_0, window_bounds = array<i64: 40, 512>}, {pipeline_mode = #tpu.pipeline_mode<synchronous>, transform_indices = @transform_1, window_bounds = array<i64: 16, 40>}, {transform_indices = @transform_2, window_bounds = array<i64: 2, 16, 256>}]} {
    %c0 = arith.constant 0 : index
    %c0_0 = arith.constant 0 : index
    %0 = vector.load %arg2[%c0, %c0_0] : memref<16x40xf32, #tpu.memory_space<vmem>>, vector<16x40xf32>
    %c0_1 = arith.constant 0 : index
    %c0_2 = arith.constant 0 : index
    %1 = vector.load %arg1[%c0_1, %c0_2] : memref<40x512xf32, #tpu.memory_space<vmem>>, vector<40x512xf32>
    %cst = arith.constant dense<0.000000e+00> : vector<16x512xf32>
    %2 = tpu.matmul %0, %1, %cst {dimension_numbers = #tpu.dot_dimension_numbers<[1], [0], [0], [1], [0, 0, 1, 1], [], []>} : vector<16x40xf32>, vector<40x512xf32>, vector<16x512xf32> -> vector<16x512xf32>
    %cst_3 = arith.constant 0.000000e+00 : f32
    %3 = vector.broadcast %cst_3 : f32 to vector<16x512xf32>
    %4 = arith.cmpf oge, %2, %3 : vector<16x512xf32>
    %cst_4 = arith.constant 0.00999999977 : f32
    %5 = vector.broadcast %cst_4 : f32 to vector<16x512xf32>
    %6 = arith.mulf %5, %2 : vector<16x512xf32>
    %7 = arith.select %4, %2, %6 : vector<16x512xi1>, vector<16x512xf32>
    %8 = vector.extract_strided_slice %7 {offsets = [0, 0], sizes = [16, 256], strides = [1, 1]} : vector<16x512xf32> to vector<16x256xf32>
    %cst_5 = arith.constant dense<0.000000e+00> : vector<16xf32>
    %9 = vector.multi_reduction <add>, %8, %cst_5 [1] : vector<16x256xf32> to vector<16xf32>
    %10 = vector.shape_cast %9 : vector<16xf32> to vector<16x1xf32>
    %cst_6 = arith.constant 2.560000e+02 : f32
    %11 = vector.broadcast %cst_6 : f32 to vector<16x1xf32>
    %12 = arith.divf %10, %11 : vector<16x1xf32>
    %13 = vector.broadcast %12 : vector<16x1xf32> to vector<16x256xf32>
    %14 = arith.subf %8, %13 : vector<16x256xf32>
    %15 = arith.mulf %14, %14 : vector<16x256xf32>
    %cst_7 = arith.constant dense<0.000000e+00> : vector<16xf32>
    %16 = vector.multi_reduction <add>, %15, %cst_7 [1] : vector<16x256xf32> to vector<16xf32>
    %17 = vector.shape_cast %16 : vector<16xf32> to vector<16x1xf32>
    %cst_8 = arith.constant 2.560000e+02 : f32
    %18 = vector.broadcast %cst_8 : f32 to vector<16x1xf32>
    %19 = arith.divf %17, %18 : vector<16x1xf32>
    %cst_9 = arith.constant 9.99999974E-6 : f32
    %20 = vector.broadcast %cst_9 : f32 to vector<16x1xf32>
    %21 = arith.addf %19, %20 : vector<16x1xf32>
    %22 = math.rsqrt %21 : vector<16x1xf32>
    %23 = vector.broadcast %22 : vector<16x1xf32> to vector<16x256xf32>
    %24 = arith.mulf %14, %23 : vector<16x256xf32>
    %c0_10 = arith.constant 0 : index
    %c0_11 = arith.constant 0 : index
    %c0_12 = arith.constant 0 : index
    %25 = vector.load %arg3[%c0_10, %c0_11, %c0_12] : memref<2x16x256xf32, #tpu.memory_space<vmem>>, vector<1x16x256xf32>
    %26 = vector.shape_cast %25 : vector<1x16x256xf32> to vector<16x256xf32>
    %27 = vector.shape_cast %24 : vector<16x256xf32> to vector<1x16x256xf32>
    tpu.vector_store %arg3[%c0_10, %c0_11, %c0_12], %27 {strides = array<i32>} : memref<2x16x256xf32, #tpu.memory_space<vmem>>, vector<1x16x256xf32>,
    %28 = vector.extract_strided_slice %7 {offsets = [0, 256], sizes = [16, 256], strides = [1, 1]} : vector<16x512xf32> to vector<16x256xf32>
    %cst_13 = arith.constant dense<0.000000e+00> : vector<16xf32>
    %29 = vector.multi_reduction <add>, %28, %cst_13 [1] : vector<16x256xf32> to vector<16xf32>
    %30 = vector.shape_cast %29 : vector<16xf32> to vector<16x1xf32>
    %cst_14 = arith.constant 2.560000e+02 : f32
    %31 = vector.broadcast %cst_14 : f32 to vector<16x1xf32>
    %32 = arith.divf %30, %31 : vector<16x1xf32>
    %33 = vector.broadcast %32 : vector<16x1xf32> to vector<16x256xf32>
    %34 = arith.subf %28, %33 : vector<16x256xf32>
    %35 = arith.mulf %34, %34 : vector<16x256xf32>
    %cst_15 = arith.constant dense<0.000000e+00> : vector<16xf32>
    %36 = vector.multi_reduction <add>, %35, %cst_15 [1] : vector<16x256xf32> to vector<16xf32>
    %37 = vector.shape_cast %36 : vector<16xf32> to vector<16x1xf32>
    %cst_16 = arith.constant 2.560000e+02 : f32
    %38 = vector.broadcast %cst_16 : f32 to vector<16x1xf32>
    %39 = arith.divf %37, %38 : vector<16x1xf32>
    %cst_17 = arith.constant 9.99999974E-6 : f32
    %40 = vector.broadcast %cst_17 : f32 to vector<16x1xf32>
    %41 = arith.addf %39, %40 : vector<16x1xf32>
    %42 = math.rsqrt %41 : vector<16x1xf32>
    %43 = vector.broadcast %42 : vector<16x1xf32> to vector<16x256xf32>
    %44 = arith.mulf %34, %43 : vector<16x256xf32>
    %c1 = arith.constant 1 : index
    %c0_18 = arith.constant 0 : index
    %c0_19 = arith.constant 0 : index
    %45 = vector.load %arg3[%c1, %c0_18, %c0_19] : memref<2x16x256xf32, #tpu.memory_space<vmem>>, vector<1x16x256xf32>
    %46 = vector.shape_cast %45 : vector<1x16x256xf32> to vector<16x256xf32>
    %47 = vector.shape_cast %44 : vector<16x256xf32> to vector<1x16x256xf32>
    tpu.vector_store %arg3[%c1, %c0_18, %c0_19], %47 {strides = array<i32>} : memref<2x16x256xf32, #tpu.memory_space<vmem>>, vector<1x16x256xf32>,
    return
  }
  func.func @transform_0(%arg0: i32) -> (i32, i32) {
    %c0_i32 = arith.constant 0 : i32
    %c0_i32_0 = arith.constant 0 : i32
    return %c0_i32, %arg0 : i32, i32
  }
  func.func @transform_1(%arg0: i32) -> (i32, i32) {
    %c0_i32 = arith.constant 0 : i32
    %c0_i32_0 = arith.constant 0 : i32
    %c0_i32_1 = arith.constant 0 : i32
    return %c0_i32, %c0_i32_0 : i32, i32
  }
  func.func @transform_2(%arg0: i32) -> (i32, i32, i32) {
    %c0_i32 = arith.constant 0 : i32
    %c0_i32_0 = arith.constant 0 : i32
    %c0_i32_1 = arith.constant 0 : i32
    return %arg0, %c0_i32, %c0_i32_0 : i32, i32, i32
  }
}

</mosaic_0001>

<bundles_post_ra>
// kernel: tpu_custom_call.1
= control target key start
LH: loop header
LB: loop body
LE: loop exit
PB: predicated region body
PF: predicated region fallthrough
CT: control target
= control target key end

     0   :  { %7 = vsyncpa [#allocation3], 0  ;;  %s495_s0 = inlined_call_operand.hbm [shape: f32[40,512], index: 0, kind: input, shape index: {}]   ;;  %s496_s1 = inlined_call_operand.hbm [shape: f32[16,40], index: 1, kind: input, shape index: {}]   ;;  %s497_s2 = inlined_call_operand.hbm [shape: f32[2,16,256], index: 2, kind: output, shape index: {}]  }
   0x1   :  { %8 = vsyncpa [#allocation6], 0 }
   0x2   :  { %9 = vsyncpa [#allocation4], 0  ;;  %s14_s11 = sshll.u32 %s495_s0, 4  ;;  %s431_s12 = smov [#allocation2]   ;;  %s15_s11 = int_to_ptr.hbm [resolvable:$true] %s14_s11 }
   0x3   :  { %s16_s13 = sshll.u32 %s431_s12, 4  ;;  %s27_s16 = sshll.u32 %s496_s1, 4  ;;  %s17_s13 = int_to_ptr.vmem [resolvable:$true] %s16_s13  ;;  %s28_s16 = int_to_ptr.hbm [resolvable:$true] %s27_s16 }
   0x4   :  { %s432_s17 = smov 512   ;;  %s433_s18 = smov 32  }
   0x5   :  { %22 = dma.hbm_to_vmem [thread:$0]  %s15_s11, 2560, %s17_s13, [#allocation3], %s432_s17, %s432_s17, %s433_s18  }
   0x6   :  { %s434_s19 = smov [#allocation5]   ;;  %s435_s21 = smov 128  }
   0x7   :  { %s29_s20 = sshll.u32 %s434_s19, 4  ;;  %s436_s22 = smov 8   ;;  %s30_s20 = int_to_ptr.vmem [resolvable:$true] %s29_s20 }
   0x8   :  { %35 = dma.hbm_to_vmem [thread:$0]  %s28_s16, 256, %s30_s20, [#allocation6], %s435_s21, %s435_s21, %s436_s22  }
   0x9   :  { %425 = dma.done.wait [#allocation3], 2560  }
   0xa   :  { %426 = vsyncadd [#allocation3], 4294964736 }
   0xb   :  { %427 = dma.done.wait [#allocation6], 256  }
   0xc   :  { %428 = vsyncadd [#allocation6], 4294967040  ;;  %v62_v0 = vld [vmem:[#allocation2 + $0x80] sm:$0xff]  ;;  %v63_v1 = vld [vmem:[#allocation2 + $0x88] sm:$0xff]  ;;  %vm66_vm0 = vcmask 326656   ;;  %v437_v50 = vmov 256.0  }
   0xd   :  { %v64_v2 = vld [vmem:[#allocation2 + $0x90] sm:$0xff]  ;;  %84 = vmatpush.msra.mxu0 %v62_v0  ;;  %107 = vmatpush.msra.mxu1 %v63_v1  ;;  %v65_v3 = vld [vmem:[#allocation2 + $0x98] sm:$0xff]  ;;  %v58_v4 = vld [vmem:[#allocation2 + $0x60] sm:$0xff]  ;;  %343 = vrcp.f32 %v437_v50  ;;  %s438_s0 = smov [#allocation7]   ;;  %s311_s25 = sshll.u32 %s497_s2, 4  ;;  %s312_s25 = int_to_ptr.hbm [resolvable:$true] %s311_s25 }
   0xe   :  { %v59_v5 = vld [vmem:[#allocation2 + $0x68] sm:$0xff]  ;;  %130 = vmatpush.msra.mxu2 %v64_v2  ;;  %153 = vmatpush.msra.mxu3 %v65_v3  ;;  %v60_v6 = vld [vmem:[#allocation2 + $0x70] sm:$0xff]  ;;  %v61_v7 = vld [vmem:[#allocation2 + $0x78] sm:$0xff]  ;;  %s309_s1 = sshll.u32 %s438_s0, 4  ;;  %s439_s26 = smov 256   ;;  %s310_s1 = int_to_ptr.vmem [resolvable:$true] %s309_s1 }
   0xf   :  { %v54_v8 = vld [vmem:[#allocation2 + $0x40] sm:$0xff]  ;;  %85 = vmatpush.msra.mxu0 %v58_v4  ;;  %108 = vmatpush.msra.mxu1 %v59_v5  ;;  %v55_v9 = vld [vmem:[#allocation2 + $0x48] sm:$0xff]  ;;  %v56_v10 = vld [vmem:[#allocation2 + $0x50] sm:$0xff]  ;;  %s440_s27 = smov 16  }
  0x10   :  { %v57_v11 = vld [vmem:[#allocation2 + $0x58] sm:$0xff]  ;;  %131 = vmatpush.msra.mxu2 %v60_v6  ;;  %154 = vmatpush.msra.mxu3 %v61_v7  ;;  %v50_v12 = vld [vmem:[#allocation2 + $0x20] sm:$0xff]  ;;  %v51_v13 = vld [vmem:[#allocation2 + $0x28] sm:$0xff] }
  0x11   :  { %86 = vmatpush.msra.mxu0 %v54_v8  ;;  %109 = vmatpush.msra.mxu1 %v55_v9  ;;  %v52_v14 = vld [vmem:[#allocation2 + $0x30] sm:$0xff]  ;;  %v53_v15 = vld [vmem:[#allocation2 + $0x38] sm:$0xff]  ;;  %v46_v16 = vld [vmem:[#allocation2] sm:$0xff] }
  0x12   :  { %132 = vmatpush.msra.mxu2 %v56_v10  ;;  %155 = vmatpush.msra.mxu3 %v57_v11  ;;  %v47_v17 = vld [vmem:[#allocation2 + $0x8] sm:$0xff]  ;;  %v48_v18 = vld [vmem:[#allocation2 + $0x10] sm:$0xff]  ;;  %v49_v19 = vld [vmem:[#allocation2 + $0x18] sm:$0xff] }
  0x13   :  { %87 = vmatpush.msra.mxu0 %v50_v12  ;;  %110 = vmatpush.msra.mxu1 %v51_v13  ;;  %v44_v20 = vld [vmem:[#allocation5] sm:$0xff]  ;;  %v45_v21 = vld [vmem:[#allocation5 + $0x8] sm:$0xff]  ;;  %v344_v51 = vpop.eup %343 }
  0x14   :  { %133 = vmatpush.msra.mxu2 %v52_v14  ;;  %156 = vmatpush.msra.mxu3 %v53_v15  ;;  %v196_v52 = vmul.f32 256.0, %v344_v51  ;;  %vm200_vm9 = vweird.f32 %v344_v51 }
  0x15   :  { %88 = vmatpush.msra.mxu0 %v46_v16  ;;  %111 = vmatpush.msra.mxu1 %v47_v17 }
  0x16   :  { %134 = vmatpush.msra.mxu2 %v48_v18  ;;  %157 = vmatpush.msra.mxu3 %v49_v19  ;;  %v197_v53 = vsub.f32 1.0, %v196_v52 }
  0x17   :  { %325 = vmatmul.msk.f32.vlgmr.msra.gmra.mxu0 %vm66_vm0, %v44_v20  ;;  %327 = vmatmul.msk.f32.vlgmr.msra.gmra.mxu1 %vm66_vm0, %v44_v20 }
  0x18   :  { %329 = vmatmul.msk.f32.vlgmr.msra.gmra.mxu2 %vm66_vm0, %v44_v20  ;;  %331 = vmatmul.msk.f32.vlgmr.msra.gmra.mxu3 %vm66_vm0, %v44_v20  ;;  %v198_v54 = vmul.f32 %v344_v51, %v197_v53 }
  0x1a   :  { %v199_v55 = vadd.f32 %v344_v51, %v198_v54 }
  0x1c   :  { %v201_v56 = vsel %vm200_vm9, %v344_v51, %v199_v55 }
  0x1f   :  { %326 = vmatmul.msk.f32.gmra.mxu0 %vm66_vm0, %v45_v21  ;;  %328 = vmatmul.msk.f32.gmra.mxu1 %vm66_vm0, %v45_v21 }
  0x20   :  { %330 = vmatmul.msk.f32.gmra.mxu2 %vm66_vm0, %v45_v21  ;;  %332 = vmatmul.msk.f32.gmra.mxu3 %vm66_vm0, %v45_v21 }
  0x94   :  { %v90_v22 = vpop.f32.mrf.mxu0  ;;  %v113_v23 = vpop.f32.mrf.mxu1 }
  0x95   :  { %v173_v24 = vmul.f32 0.01, %v90_v22  ;;  %v174_v25 = vmul.f32 0.01, %v113_v23  ;;  %vm165_vm1 = vcmp.ge.f32.partialorder %v90_v22, 0.0  ;;  %vm166_vm2 = vcmp.ge.f32.partialorder %v113_v23, 0.0 }
  0x97   :  { %v181_v26 = vsel %vm165_vm1, %v90_v22, %v173_v24  ;;  %v182_v27 = vsel %vm166_vm2, %v113_v23, %v174_v25 }
  0x98   :  { %v189_v28 = vadd.f32 %v182_v27, %v181_v26 }
  0x9a   :  { %190 = vadd.xlane.f32.xlu0 %v189_v28 }
  0x9b   :  { %v136_v29 = vpop.f32.mrf.mxu2  ;;  %v159_v30 = vpop.f32.mrf.mxu3 }
  0x9c   :  { %v175_v31 = vmul.f32 0.01, %v136_v29  ;;  %v176_v32 = vmul.f32 0.01, %v159_v30  ;;  %v93_v33 = vpop.f32.mrf.mxu0  ;;  %v116_v34 = vpop.f32.mrf.mxu1  ;;  %vm167_vm3 = vcmp.ge.f32.partialorder %v136_v29, 0.0  ;;  %vm168_vm4 = vcmp.ge.f32.partialorder %v159_v30, 0.0 }
  0x9d   :  { %vm169_vm5 = vcmp.ge.f32.partialorder %v93_v33, 0.0  ;;  %v177_v35 = vmul.f32 0.01, %v93_v33  ;;  %vm170_vm6 = vcmp.ge.f32.partialorder %v116_v34, 0.0  ;;  %v178_v36 = vmul.f32 0.01, %v116_v34 }
  0x9e   :  { %v183_v37 = vsel %vm167_vm3, %v136_v29, %v175_v31  ;;  %v184_v38 = vsel %vm168_vm4, %v159_v30, %v176_v32 }
  0x9f   :  { %v185_v39 = vsel %vm169_vm5, %v93_v33, %v177_v35  ;;  %v186_v40 = vsel %vm170_vm6, %v116_v34, %v178_v36  ;;  %v250_v41 = vadd.f32 %v184_v38, %v183_v37 }
  0xa0   :  { %v192_v42 = vadd.f32 %v186_v40, %v185_v39 }
  0xa1   :  { %251 = vadd.xlane.f32.xlu1 %v250_v41 }
  0xa2   :  { %193 = vadd.xlane.f32.xlu0 %v192_v42 }
  0xa3   :  { %v139_v43 = vpop.f32.mrf.mxu2  ;;  %v162_v44 = vpop.f32.mrf.mxu3 }
  0xa4   :  { %vm171_vm7 = vcmp.ge.f32.partialorder %v139_v43, 0.0  ;;  %v179_v45 = vmul.f32 0.01, %v139_v43  ;;  %vm172_vm8 = vcmp.ge.f32.partialorder %v162_v44, 0.0  ;;  %v180_v46 = vmul.f32 0.01, %v162_v44 }
  0xa6   :  { %v187_v47 = vsel %vm171_vm7, %v139_v43, %v179_v45  ;;  %v188_v48 = vsel %vm172_vm8, %v162_v44, %v180_v46 }
  0xa7   :  { %v253_v49 = vadd.f32 %v188_v48, %v187_v47 }
  0xa9   :  { %254 = vadd.xlane.f32.xlu1 %v253_v49 }
 0x10d   :  { %v191_v57 = vpop.xlane.xlu0 %190 }
 0x10e   :  { %v202_v58 = vmul.f32 %v201_v56, %v191_v57 }
 0x110   :  { %v204_v59 = vsub.f32 %v181_v26, %v202_v58  ;;  %v205_v60 = vsub.f32 %v182_v27, %v202_v58 }
 0x112   :  { %v208_v61 = vmul.f32 %v204_v59, %v204_v59  ;;  %v209_v62 = vmul.f32 %v205_v60, %v205_v60 }
 0x114   :  { %v252_v63 = vpop.xlane.xlu1 %251  ;;  %v212_v0 = vadd.f32 %v209_v62, %v208_v61 }
 0x115   :  { %v256_v1 = vmul.f32 %v252_v63, %v201_v56  ;;  %v194_v2 = vpop.xlane.xlu0 %193 }
 0x116   :  { %v203_v3 = vmul.f32 %v201_v56, %v194_v2  ;;  %213 = vadd.xlane.f32.xlu2 %v212_v0 }
 0x117   :  { %v462_v4 = vsub.f32 %v183_v37, %v256_v1  ;;  %v464_v5 = vsub.f32 %v184_v38, %v256_v1 }
 0x118   :  { %v466_v6 = vsub.f32 %v185_v39, %v203_v3  ;;  %v468_v7 = vsub.f32 %v186_v40, %v203_v3 }
 0x119   :  { %v262_v8 = vmul.f32 %v462_v4, %v462_v4  ;;  %v263_v9 = vmul.f32 %v464_v5, %v464_v5 }
 0x11a   :  { %v210_v10 = vmul.f32 %v466_v6, %v466_v6  ;;  %v211_v11 = vmul.f32 %v468_v7, %v468_v7 }
 0x11b   :  { %v266_v12 = vadd.f32 %v263_v9, %v262_v8 }
 0x11c   :  { %v255_v13 = vpop.xlane.xlu1 %254  ;;  %v215_v14 = vadd.f32 %v211_v11, %v210_v10 }
 0x11d   :  { %v257_v15 = vmul.f32 %v255_v13, %v201_v56  ;;  %267 = vadd.xlane.f32.xlu0 %v266_v12 }
 0x11e   :  { %216 = vadd.xlane.f32.xlu2 %v215_v14 }
 0x11f   :  { %v478_v16 = vsub.f32 %v187_v47, %v257_v15  ;;  %v480_v17 = vsub.f32 %v188_v48, %v257_v15 }
 0x121   :  { %v264_v18 = vmul.f32 %v478_v16, %v478_v16  ;;  %v265_v19 = vmul.f32 %v480_v17, %v480_v17 }
 0x123   :  { %v269_v20 = vadd.f32 %v265_v19, %v264_v18 }
 0x125   :  { %270 = vadd.xlane.f32.xlu1 %v269_v20 }
 0x189   :  { %v214_v21 = vpop.xlane.xlu2 %213 }
 0x18a   :  { %v218_v22 = vmul.f32 %v214_v21, %v201_v56 }
 0x18c   :  { %v220_v23 = vadd.f32 1e-05, %v218_v22 }
 0x18e   :  { %345 = vrsqrt.f32 %v220_v23  ;;  %vm228_vm11 = vweird.f32 %v220_v23 }
 0x190   :  { %v268_v24 = vpop.xlane.xlu0 %267 }
 0x191   :  { %v272_v25 = vmul.f32 %v268_v24, %v201_v56  ;;  %v217_v26 = vpop.xlane.xlu2 %216 }
 0x192   :  { %v219_v27 = vmul.f32 %v217_v26, %v201_v56 }
 0x193   :  { %v274_v28 = vadd.f32 1e-05, %v272_v25 }
 0x194   :  { %v346_v29 = vpop.eup %345  ;;  %v221_v30 = vadd.f32 1e-05, %v219_v27 }
 0x195   :  { %v223_v31 = vmul.f32 %v346_v29, %v220_v23  ;;  %347 = vrsqrt.f32 %v274_v28  ;;  %vm229_vm10 = vweird.f32 %v346_v29  ;;  %vm282_vm15 = vweird.f32 %v274_v28 }
 0x196   :  { %349 = vrsqrt.f32 %v221_v30  ;;  %vm230_vm12 = vmor %vm228_vm11, %vm229_vm10  ;;  %vm238_vm1 = vweird.f32 %v221_v30 }
 0x197   :  { %v224_v32 = vmul.f32 %v346_v29, %v223_v31 }
 0x198   :  { %v271_v33 = vpop.xlane.xlu1 %270 }
 0x199   :  { %v225_v34 = vmul.f32 0.5, %v224_v32  ;;  %v273_v35 = vmul.f32 %v271_v33, %v201_v56 }
 0x19b   :  { %v348_v36 = vpop.eup %347  ;;  %v226_v37 = vsub.f32 1.5, %v225_v34  ;;  %v275_v38 = vadd.f32 1e-05, %v273_v35 }
 0x19c   :  { %v350_v39 = vpop.eup %349  ;;  %v277_v40 = vmul.f32 %v348_v36, %v274_v28  ;;  %vm283_vm13 = vweird.f32 %v348_v36 }
 0x19d   :  { %v227_v41 = vmul.f32 %v346_v29, %v226_v37  ;;  %v233_v42 = vmul.f32 %v350_v39, %v221_v30  ;;  %351 = vrsqrt.f32 %v275_v38  ;;  %vm239_vm14 = vweird.f32 %v350_v39  ;;  %vm284_vm0 = vmor %vm282_vm15, %vm283_vm13 }
 0x19e   :  { %v278_v43 = vmul.f32 %v348_v36, %v277_v40  ;;  %vm240_vm2 = vmor %vm238_vm1, %vm239_vm14  ;;  %vm292_vm4 = vweird.f32 %v275_v38 }
 0x19f   :  { %v231_v44 = vsel %vm230_vm12, %v346_v29, %v227_v41  ;;  %v234_v45 = vmul.f32 %v350_v39, %v233_v42 }
 0x1a0   :  { %v242_v46 = vmul.f32 %v231_v44, %v204_v59  ;;  %v243_v47 = vmul.f32 %v231_v44, %v205_v60  ;;  %v279_v48 = vmul.f32 0.5, %v278_v43 }
 0x1a1   :  { %v235_v49 = vmul.f32 0.5, %v234_v45 }
 0x1a2   :  { %246 = vst [vmem:[#allocation7] sm:$0xff] %v242_v46  ;;  %v280_v50 = vsub.f32 1.5, %v279_v48 }
 0x1a3   :  { %v352_v51 = vpop.eup %351  ;;  %247 = vst [vmem:[#allocation7 + $0x8] sm:$0xff] %v243_v47  ;;  %v236_v52 = vsub.f32 1.5, %v235_v49 }
 0x1a4   :  { %v281_v53 = vmul.f32 %v348_v36, %v280_v50  ;;  %v287_v54 = vmul.f32 %v352_v51, %v275_v38  ;;  %vm293_vm3 = vweird.f32 %v352_v51 }
 0x1a5   :  { %v237_v55 = vmul.f32 %v350_v39, %v236_v52  ;;  %vm294_vm5 = vmor %vm292_vm4, %vm293_vm3 }
 0x1a6   :  { %v285_v56 = vsel %vm284_vm0, %v348_v36, %v281_v53  ;;  %v288_v57 = vmul.f32 %v352_v51, %v287_v54 }
 0x1a7   :  { %v296_v58 = vmul.f32 %v285_v56, %v462_v4  ;;  %v297_v59 = vmul.f32 %v285_v56, %v464_v5  ;;  %v241_v60 = vsel %vm240_vm2, %v350_v39, %v237_v55 }
 0x1a8   :  { %v244_v61 = vmul.f32 %v241_v60, %v466_v6  ;;  %v245_v62 = vmul.f32 %v241_v60, %v468_v7  ;;  %v289_v63 = vmul.f32 0.5, %v288_v57 }
 0x1a9   :  { %301 = vst [vmem:[#allocation7 + $0x20] sm:$0xff] %v296_v58 }
 0x1aa   :  { %302 = vst [vmem:[#allocation7 + $0x28] sm:$0xff] %v297_v59  ;;  %v290_v0 = vsub.f32 1.5, %v289_v63 }
 0x1ab   :  { %248 = vst [vmem:[#allocation7 + $0x10] sm:$0xff] %v244_v61 }
 0x1ac   :  { %249 = vst [vmem:[#allocation7 + $0x18] sm:$0xff] %v245_v62  ;;  %v291_v1 = vmul.f32 %v352_v51, %v290_v0 }
 0x1ae   :  { %v295_v2 = vsel %vm294_vm5, %v352_v51, %v291_v1 }
 0x1af   :  { %v298_v3 = vmul.f32 %v295_v2, %v478_v16  ;;  %v299_v4 = vmul.f32 %v295_v2, %v480_v17 }
 0x1b1   :  { %303 = vst [vmem:[#allocation7 + $0x30] sm:$0xff] %v298_v3 }
 0x1b2   :  { %304 = vst [vmem:[#allocation7 + $0x38] sm:$0xff] %v299_v4 }
 0x1b3   :  { %317 = dma.vmem_to_hbm [thread:$0]  %s310_s1, 1024, %s312_s25, [#allocation4], %s439_s26, %s439_s26, %s440_s27  }
 0x1b4   :  { %429 = dma.done.wait [#allocation4], 1024  }
 0x1b5   :  { %430 = vsyncadd [#allocation4], 4294966272 }
 0x1b6   :  { %322 = vsyncpa [#allocation3], 1 }
 0x1b7   :  { %323 = vsyncpa [#allocation6], 1 }
 0x1b8   :  { %324 = vsyncpa [#allocation4], 1 }

</bundles_post_ra>
